<compile_context>
chip_gen: v7x
topology: tpu7x:2x2x1
jax: 0.10.0
libtpu: 0.0.40
codegen_flags: <defaults>
</compile_context>

<pallas_src>
import functools
import math

import numpy as np

import jax
import jax.numpy as jnp
from jax.experimental import pallas as pl
from jax.experimental.pallas import tpu as pltpu


_LN10000 = math.log(10000.0)


def _freq_phase(embed_dim: int):
    """Static per-lane tables so that emb[t, e] = sin(t * freq[e] + phase[e]).

    Even lanes: sin(t * exp(-ln(1e4)/E * e))
    Odd  lanes: cos(t * exp(-ln(1e4)/E * (e-1))) == sin(same + pi/2)
    """
    lane = np.arange(embed_dim)
    parity = lane % 2                                  # 0 -> sin lane, 1 -> cos lane
    freq = np.exp((lane - parity).astype(np.float64) * (-(_LN10000 / embed_dim)))
    phase = parity.astype(np.float64) * (np.pi / 2.0)
    return freq.astype(np.float32), phase.astype(np.float32)


# --------------------------------------------------------------------------- #
# Standalone SinusoidalEmbeddings.forward: t -> (B, E, 1, 1)                   #
# (kept for API parity; in the UNET the fused kernels below replace it)        #
# --------------------------------------------------------------------------- #
def _sin_embed_kernel(t_ref, freq_ref, phase_ref, out_ref):
    # t: (B,1) f32, freq/phase: (1,E) f32.  Single full-block (B,E) store; no
    # per-row masked stores.
    out_ref[...] = jnp.sin(t_ref[...] * freq_ref[...] + phase_ref[...])


def sinusoidal_embeddings(t: jax.Array, embed_dim: int) -> jax.Array:
    """t: (B,) integer timesteps. Returns (B, embed_dim, 1, 1) f32 (PyTorch semantics)."""
    B = t.shape[0]
    freq, phase = _freq_phase(embed_dim)
    out = pl.pallas_call(
        _sin_embed_kernel,
        out_shape=jax.ShapeDtypeStruct((B, embed_dim), jnp.float32),
        in_specs=[
            pl.BlockSpec((B, 1), lambda: (0, 0)),
            pl.BlockSpec((1, embed_dim), lambda: (0, 0)),
            pl.BlockSpec((1, embed_dim), lambda: (0, 0)),
        ],
        out_specs=pl.BlockSpec((B, embed_dim), lambda: (0, 0)),
    )(t.astype(jnp.float32).reshape(B, 1),
      jnp.asarray(freq)[None, :], jnp.asarray(phase)[None, :])
    return out[:, :, None, None]


# --------------------------------------------------------------------------- #
# Fused ResBlock entry add: x + SinusoidalEmbeddings(t)[:, :C, None, None]     #
# --------------------------------------------------------------------------- #
def _add_embed_kernel(t_ref, freq_ref, phase_ref, x_ref, out_ref):
    # t_ref:              SMEM (B,) int32 (scalar prefetch)
    # freq_ref/phase_ref: VMEM f32 blocks, pre-broadcast to exactly the x block
    # x_ref/out_ref:      VMEM blocks of the lane-dense (B, S, L) view of x
    b = pl.program_id(0)
    t = t_ref[b].astype(jnp.float32)
    emb = jnp.sin(t * freq_ref[...] + phase_ref[...])          # f32, block-shaped
    out_ref[...] = (x_ref[...].astype(jnp.float32) + emb).astype(out_ref.dtype)


def add_time_embedding(x: jax.Array, t: jax.Array, embed_dim: int,
                       *, max_block_elems: int = 128 * 1024) -> jax.Array:
    """Fused `x + embeddings(t)[:, :C, None, None]` (first line of ResBlock.forward).

    x: (B, C, H, W) in f32 or bf16, t: (B,) integer timesteps.
    """
    B, C, H, W = x.shape
    HW = H * W
    assert C <= embed_dim
    freq, phase = _freq_phase(embed_dim)
    freq_c, phase_c = freq[:C], phase[:C]

    if HW % 128 == 0 and C * HW > max_block_elems:
        # Large lane-aligned map: keep (B, C, HW) and tile the spatial (lane)
        # axis so the pipeline has several >=128-lane steps.  The freq/phase
        # blocks have a constant block index -> DMA'd once, VMEM-resident.
        S, L = C, HW
        cap = max(128, ((max_block_elems // C) // 128) * 128)
        l_blk = 128
        for cand in range(128, min(L, cap) + 1, 128):
            if L % cand == 0:
                l_blk = cand
        grid = (B, L // l_blk)
        blk = (1, C, l_blk)
        x_map = lambda b, j, t_s: (b, 0, j)
        tbl_map = lambda b, j, t_s: (0, 0, 0)
        freq_tbl = np.ascontiguousarray(np.broadcast_to(freq_c[None, :, None], blk))
        phase_tbl = np.ascontiguousarray(np.broadcast_to(phase_c[None, :, None], blk))
    else:
        # Small map, or deep stage with H*W < 128: one lane-dense block per
        # batch element (single pipeline step per element).
        if HW % 128 == 0:
            S, L = C, HW                           # natural (C, HW) view
        elif (C * HW) % 128 == 0:
            S, L = (C * HW) // 128, 128            # flatten -> exactly 128 lanes
        else:
            S, L = 1, C * HW                       # rare fallback (full block)
        grid = (B,)
        blk = (1, S, L)
        x_map = lambda b, t_s: (b, 0, 0)
        tbl_map = lambda b, t_s: (0, 0, 0)
        # Row-major flatten of (C, HW) => value for element f is freq_c[f // HW].
        freq_tbl = np.repeat(freq_c, HW).reshape(blk)
        phase_tbl = np.repeat(phase_c, HW).reshape(blk)

    x3 = x.reshape(B, S, L)
    out = pl.pallas_call(
        _add_embed_kernel,
        out_shape=jax.ShapeDtypeStruct((B, S, L), x.dtype),
        grid_spec=pltpu.PrefetchScalarGridSpec(
            num_scalar_prefetch=1,
            grid=grid,
            in_specs=[pl.BlockSpec(blk, tbl_map),
                      pl.BlockSpec(blk, tbl_map),
                      pl.BlockSpec(blk, x_map)],
            out_specs=pl.BlockSpec(blk, x_map),
        ),
        compiler_params=pltpu.CompilerParams(
            dimension_semantics=("parallel",) * len(grid)),
    )(t.astype(jnp.int32), jnp.asarray(freq_tbl), jnp.asarray(phase_tbl), x3)
    return out.reshape(B, C, H, W)


# --------------------------------------------------------------------------- #
# Fused ResBlock entry: y = x + emb ; a = relu(GroupNorm(y))                   #
# --------------------------------------------------------------------------- #
def _resblock_entry_kernel(t_ref, params_ref, gmat_ref, x_ref, y_ref, a_ref,
                           *, inv_count: float, eps: float):
    # t_ref:      SMEM (B,) int32 (scalar prefetch)
    # params_ref: VMEM (C, 4) f32 -- lanes [freq, phase, gamma, beta]
    # gmat_ref:   VMEM (C, C) f32 -- P[i,j] = 1 iff channels i, j share a group
    # x_ref:      VMEM (1, C, HW)
    # y_ref:      out  (1, C, HW)  = x + emb
    # a_ref:      out  (1, C, HW)  = relu(groupnorm(y))
    b = pl.program_id(0)
    t = t_ref[b].astype(jnp.float32)
    p = params_ref[...]
    freq, phase = p[:, 0:1], p[:, 1:2]
    gamma, beta = p[:, 2:3], p[:, 3:4]

    emb = jnp.sin(t * freq + phase)                              # (C, 1) f32
    y = x_ref[0].astype(jnp.float32) + emb                       # (C, HW) f32
    y_ref[0] = y.astype(y_ref.dtype)

    # Per-group mean / biased variance, broadcast back to channels using one
    # small MXU matmul (avoids awkward sublane reshapes of the (C, HW) tile).
    P = gmat_ref[...]
    gsum = jnp.sum(jnp.dot(P, y, preferred_element_type=jnp.float32),
                   axis=1, keepdims=True)                        # (C, 1) group sums
    gsq = jnp.sum(jnp.dot(P, y * y, preferred_element_type=jnp.float32),
                  axis=1, keepdims=True)
    mean = gsum * inv_count
    var = gsq * inv_count - mean * mean
    inv_std = jax.lax.rsqrt(var + eps)                           # EUP
    a = jnp.maximum((y - mean) * inv_std * gamma + beta, 0.0)
    a_ref[0] = a.astype(a_ref.dtype)


def resblock_entry(x: jax.Array, t: jax.Array, embed_dim: int, num_groups: int,
                   gamma: jax.Array, beta: jax.Array, *, eps: float = 1e-5):
    """Fused `y = x + emb(t)[:, :C]` followed by `a = relu(GroupNorm(y))`.

    Returns (y, a): y feeds the residual / second gnorm branch, a feeds conv1.
    """
    B, C, H, W = x.shape
    HW = H * W
    assert C <= embed_dim and C % num_groups == 0
    freq, phase = _freq_phase(embed_dim)
    params = jnp.stack([jnp.asarray(freq[:C]), jnp.asarray(phase[:C]),
                        gamma.astype(jnp.float32), beta.astype(jnp.float32)],
                       axis=1)                                   # (C, 4)
    cpg = C // num_groups
    gidx = np.arange(C) // cpg
    gmat = (gidx[:, None] == gidx[None, :]).astype(np.float32)   # (C, C)
    x3 = x.reshape(B, C, HW)

    kernel = functools.partial(_resblock_entry_kernel,
                               inv_count=1.0 / float(cpg * HW), eps=float(eps))
    y, a = pl.pallas_call(
        kernel,
        out_shape=(jax.ShapeDtypeStruct((B, C, HW), x.dtype),
                   jax.ShapeDtypeStruct((B, C, HW), x.dtype)),
        grid_spec=pltpu.PrefetchScalarGridSpec(
            num_scalar_prefetch=1,
            grid=(B,),
            in_specs=[
                pl.BlockSpec((C, 4), lambda b, t_s: (0, 0)),
                pl.BlockSpec((C, C), lambda b, t_s: (0, 0)),
                pl.BlockSpec((1, C, HW), lambda b, t_s: (b, 0, 0)),
            ],
            out_specs=(pl.BlockSpec((1, C, HW), lambda b, t_s: (b, 0, 0)),
                       pl.BlockSpec((1, C, HW), lambda b, t_s: (b, 0, 0))),
        ),
        compiler_params=pltpu.CompilerParams(dimension_semantics=("parallel",)),
    )(t.astype(jnp.int32), params, jnp.asarray(gmat), x3)
    return y.reshape(B, C, H, W), a.reshape(B, C, H, W)


# --------------------------------------------------------------------------- #
# Pure-JAX references (replicate the PyTorch semantics)                        #
# --------------------------------------------------------------------------- #
def _reference_embed(t: jax.Array, time_steps: int, embed_dim: int) -> jax.Array:
    position = jnp.arange(time_steps, dtype=jnp.float32)[:, None]
    div = jnp.exp(jnp.arange(0, embed_dim, 2, dtype=jnp.float32)
                  * -(_LN10000 / embed_dim))
    table = jnp.zeros((time_steps, embed_dim), jnp.float32)
    table = table.at[:, 0::2].set(jnp.sin(position * div))
    table = table.at[:, 1::2].set(jnp.cos(position * div))
    return table[t][:, :, None, None]


def _reference_groupnorm_relu(y, num_groups, gamma, beta, eps=1e-5):
    B, C, H, W = y.shape
    yg = y.reshape(B, num_groups, -1)
    mean = yg.mean(axis=-1, keepdims=True)
    var = yg.var(axis=-1, keepdims=True)
    yn = ((yg - mean) / jnp.sqrt(var + eps)).reshape(B, C, H, W)
    return jnp.maximum(yn * gamma[None, :, None, None] + beta[None, :, None, None], 0.0)


if __name__ == "__main__":
    key = jax.random.PRNGKey(0)
    time_steps = 1000
    embed_dim = 512              # max(Channels) in the UNET config -> 4 * 128 lanes
    num_groups = 32

    kx, kt, kg, kb, kx2, kx3 = jax.random.split(key, 6)
    B = 2
    t = jax.random.randint(kt, (B,), 0, time_steps, dtype=jnp.int32)

    # --- standalone SinusoidalEmbeddings.forward ------------------------------
    emb = jax.block_until_ready(sinusoidal_embeddings(t, embed_dim))
    ref_emb = _reference_embed(t, time_steps, embed_dim)
    assert emb.shape == (B, embed_dim, 1, 1) and emb.dtype == jnp.float32
    assert jnp.allclose(emb, ref_emb, atol=1e-3, rtol=1e-3), "embedding mismatch"

    # --- fused add, shallow stage (Channels[0]=64, one block per batch), f32 --
    x = jax.random.normal(kx, (B, 64, 16, 16), dtype=jnp.float32)
    out = jax.block_until_ready(add_time_embedding(x, t, embed_dim))
    ref = x + ref_emb[:, :64, :, :]
    assert out.shape == x.shape and out.dtype == x.dtype
    assert jnp.allclose(out, ref, atol=1e-3, rtol=1e-3), "fused add mismatch (shallow)"

    # --- fused add, deep stage (H*W=64<128 -> flattened lane-dense view), bf16 -
    xd = jax.random.normal(kx2, (B, 512, 8, 8), dtype=jnp.float32).astype(jnp.bfloat16)
    outd = jax.block_until_ready(add_time_embedding(xd, t, embed_dim))
    refd = (xd.astype(jnp.float32) + ref_emb[:, :512, :, :]).astype(jnp.bfloat16)
    assert outd.shape == xd.shape and outd.dtype == jnp.bfloat16
    assert jnp.allclose(outd.astype(jnp.float32), refd.astype(jnp.float32),
                        atol=5e-2, rtol=5e-2), "fused add mismatch (deep/bf16)"

    # --- fused add, large map (spatial-tiled grid, parallel spatial axis), f32 -
    xl = jax.random.normal(kx3, (B, 64, 64, 64), dtype=jnp.float32)
    outl = jax.block_until_ready(add_time_embedding(xl, t, embed_dim))
    refl = xl + ref_emb[:, :64, :, :]
    assert jnp.allclose(outl, refl, atol=1e-3, rtol=1e-3), "fused add mismatch (large)"

    # --- fused ResBlock entry: x + emb, then GroupNorm + ReLU -----------------
    gamma = jax.random.normal(kg, (64,), dtype=jnp.float32)
    beta = jax.random.normal(kb, (64,), dtype=jnp.float32)
    y, a = resblock_entry(x, t, embed_dim, num_groups, gamma, beta)
    y, a = jax.block_until_ready((y, a))
    ref_y = x + ref_emb[:, :64, :, :]
    ref_a = _reference_groupnorm_relu(ref_y, num_groups, gamma, beta)
    assert jnp.allclose(y, ref_y, atol=1e-3, rtol=1e-3), "resblock_entry y mismatch"
    assert jnp.allclose(a, ref_a, atol=5e-3, rtol=5e-3), "resblock_entry gnorm mismatch"

    print("KERNEL_OK")
</pallas_src>

<mosaic_0001>
module attributes {stable_mosaic.version = 11 : i64} {
  func.func @_sin_embed_kernel(%arg0: memref<2x1xf32, #tpu.memory_space<vmem>>, %arg1: memref<1x512xf32, #tpu.memory_space<vmem>>, %arg2: memref<1x512xf32, #tpu.memory_space<vmem>>, %arg3: memref<2x512xf32, #tpu.memory_space<vmem>>) attributes {dimension_semantics = [], scalar_prefetch = 0 : i64, scratch_operands = 0 : i64, tpu.core_type = #tpu.core_type<tc>} {
    %c0 = arith.constant 0 : index
    %c0_0 = arith.constant 0 : index
    %0 = vector.load %arg0[%c0, %c0_0] : memref<2x1xf32, #tpu.memory_space<vmem>>, vector<2x1xf32>
    %c0_1 = arith.constant 0 : index
    %c0_2 = arith.constant 0 : index
    %1 = vector.load %arg1[%c0_1, %c0_2] : memref<1x512xf32, #tpu.memory_space<vmem>>, vector<1x512xf32>
    %2 = vector.broadcast %0 : vector<2x1xf32> to vector<2x512xf32>
    %3 = vector.broadcast %1 : vector<1x512xf32> to vector<2x512xf32>
    %4 = arith.mulf %2, %3 : vector<2x512xf32>
    %c0_3 = arith.constant 0 : index
    %c0_4 = arith.constant 0 : index
    %5 = vector.load %arg2[%c0_3, %c0_4] : memref<1x512xf32, #tpu.memory_space<vmem>>, vector<1x512xf32>
    %6 = vector.broadcast %5 : vector<1x512xf32> to vector<2x512xf32>
    %7 = arith.addf %4, %6 : vector<2x512xf32>
    %8 = math.sin %7 : vector<2x512xf32>
    %c0_5 = arith.constant 0 : index
    %c0_6 = arith.constant 0 : index
    %9 = vector.load %arg3[%c0_5, %c0_6] : memref<2x512xf32, #tpu.memory_space<vmem>>, vector<2x512xf32>
    tpu.vector_store %arg3[%c0_5, %c0_6], %8 {strides = array<i32>} : memref<2x512xf32, #tpu.memory_space<vmem>>, vector<2x512xf32>,
    return
  }
}

</mosaic_0001>

<bundles_post_ra>
// kernel: tpu_custom_call.1
= control target key start
LH: loop header
LB: loop body
LE: loop exit
PB: predicated region body
PF: predicated region fallthrough
CT: control target
= control target key end

     0   :  { %s948_s0 = inlined_call_operand.vmem [shape: f32[2,1], index: 0, kind: input, shape index: {}]   ;;  %s949_s1 = inlined_call_operand.vmem [shape: f32[1,512], index: 1, kind: input, shape index: {}]   ;;  %s950_s2 = inlined_call_operand.vmem [shape: f32[1,512], index: 2, kind: input, shape index: {}]   ;;  %s951_s3 = inlined_call_operand.hbm [shape: f32[2,512], index: 3, kind: output, shape index: {}]  }
   0x1   :  { %v15_v0 = vld [vmem:[%s948_s0] sm:$0x3] }
   0x2   :  { %8 = vsyncpa [#allocation3], 0  ;;  %v608_v1 = vmov 0   ;;  %v23_v2 = vlaneseq  ;;  %v16_v7 = vld [vmem:[%s949_s1] sm:$0xf]  ;;  %s616_s0 = smov [#allocation2]  }
   0x3   :  { %567 = vset.pattern.permute.xlu0 %v608_v1  ;;  %v47_v8 = vld [vmem:[%s950_s2] sm:$0xf]  ;;  %v609_v51 = vmov 683565275   ;;  %v610_v55 = vmov 2475754826  }
   0x4   :  { %19 = vperm.xlu0 %567, %v15_v0   ;;  %v640_v3 = vshrl.u32 %v23_v2, 7  ;;  %v611_v57 = vmov 2131351028   ;;  %v612_v59 = vmov 2102212464   ;;  %s518_s1 = sshll.u32 %s616_s0, 4  ;;  %s519_s1 = int_to_ptr.vmem [resolvable:$true] %s518_s1 }
   0x5   :  { %v613_v61 = vmov 920167782   ;;  %s584_s2 = scalar_lea.vmem %s519_s1, 128  ;;  %p589_p1 = scmp.lt.s32.totalorder %s519_s1, %s519_s1 }
   0x6   :  { %v25_v4 = vsub.s32 0, %v640_v3  ;;  %v29_v5 = vsub.s32 1, %v640_v3  ;;  %v33_v6 = vsub.s32 2, %v640_v3  ;;  %v37_v26 = vsub.s32 3, %v640_v3  ;;  %p585_p0 = scmp.ne.s32.totalorder %s519_s1, %s584_s2  ;;  %p590_p2 = scmp.lt.s32.totalorder %s584_s2, %s584_s2 }
   0x8   :  { %v26_v9 = vrot.slane %v16_v7, %v25_v4  ;;  %v30_v10 = vrot.slane %v16_v7, %v29_v5  ;;  %v34_v11 = vrot.slane %v16_v7, %v33_v6  ;;  %v52_v12 = vrot.slane %v47_v8, %v25_v4  ;;  %p591_p3 = por %p590_p2, %p589_p1 }
   0x9   :  { %v56_v13 = vrot.slane %v47_v8, %v29_v5  ;;  %v60_v15 = vrot.slane %v47_v8, %v33_v6  ;;  %v38_v35 = vrot.slane %v16_v7, %v37_v26  ;;  %v667_v41 = vrot.slane %v47_v8, %v37_v26 }
   0xa   :  { %v614_v5 = vmov 1326507024   ;;  %p592_p4 = pnand %p591_p3, %p585_p0 }
  0x83   :  { %v20_v14 = vpop.permute.xlu0 %19 }
  0x84   :  { %v43_v16 = vmul.f32 %v26_v9, %v20_v14  ;;  %v44_v17 = vmul.f32 %v30_v10, %v20_v14  ;;  %v45_v18 = vmul.f32 %v34_v11, %v20_v14  ;;  %v669_v46 = vmul.f32 %v38_v35, %v20_v14 }
  0x86   :  { %v651_v19 = vadd.f32 %v52_v12, %v43_v16  ;;  %v653_v20 = vadd.f32 %v56_v13, %v44_v17  ;;  %v655_v21 = vadd.f32 %v60_v15, %v45_v18 }
  0x88   :  { %v73_v22 = vand.u32 2147483647, %v651_v19  ;;  %v76_v23 = vand.u32 2139095040, %v651_v19  ;;  %v177_v24 = vand.u32 2147483647, %v653_v20  ;;  %v180_v25 = vand.u32 2139095040, %v653_v20 }
  0x89   :  { %v284_v31 = vand.u32 2139095040, %v655_v21 }
  0x8a   :  { %v77_v27 = vshrl.u32 %v76_v23, 23  ;;  %v80_v28 = vand.u32 8388607, %v73_v22  ;;  %v181_v29 = vshrl.u32 %v180_v25, 23  ;;  %v184_v30 = vand.u32 8388607, %v177_v24 }
  0x8b   :  { %v285_v34 = vshrl.u32 %v284_v31, 23 }
  0x8c   :  { %v526_v32 = vadd.s32 4294967169, %v77_v27  ;;  %v530_v33 = vadd.s32 4294967169, %v181_v29  ;;  %v81_v37 = vor.u32 8388608, %v80_v28  ;;  %v185_v38 = vor.u32 8388608, %v184_v30 }
  0x8d   :  { %v534_v40 = vadd.s32 4294967169, %v285_v34 }
  0x8e   :  { %v83_v36 = vadd.s32 1, %v526_v32  ;;  %v187_v39 = vadd.s32 1, %v530_v33  ;;  %v671_v47 = vshll.u32 %v81_v37, 8  ;;  %v673_v48 = vshll.u32 %v185_v38, 8 }
  0x8f   :  { %v675_v49 = vadd.s32 1, %v534_v40 }
  0x90   :  { %vm84_vm0 = vcmp.gt.s32.totalorder %v83_v36, 0  ;;  %vm188_vm1 = vcmp.gt.s32.totalorder %v187_v39, 0 }
  0x91   :  { %v85_v42 = vsel %vm84_vm0, %v83_v36, 0  ;;  %v189_v45 = vsel %vm188_vm1, %v187_v39, 0  ;;  %vm292_vm6 = vcmp.gt.s32.totalorder %v675_v49, 0 }
  0x92   :  { %v86_v43 = vshrl.u32 %v85_v42, 5  ;;  %v87_v44 = vand.u32 31, %v85_v42  ;;  %v678_v53 = vshrl.u32 %v189_v45, 5  ;;  %v191_v54 = vand.u32 31, %v189_v45 }
  0x94   :  { %v88_v50 = vsub.s32 32, %v87_v44  ;;  %v90_v52 = vshll.u32 %v609_v51, %v87_v44  ;;  %v93_v56 = vshll.u32 %v610_v55, %v87_v44  ;;  %v96_v58 = vshll.u32 %v611_v57, %v87_v44 }
  0x95   :  { %v99_v60 = vshll.u32 %v612_v59, %v87_v44  ;;  %v102_v62 = vshll.u32 %v613_v61, %v87_v44  ;;  %vm105_vm2 = vcmp.lt.s32.totalorder %v86_v43, 1  ;;  %vm106_vm3 = vcmp.lt.s32.totalorder %v86_v43, 2 }
  0x96   :  { %v91_v63 = vshrl.u32 %v610_v55, %v88_v50  ;;  %v94_v0 = vshrl.u32 %v611_v57, %v88_v50  ;;  %v97_v1 = vshrl.u32 %v612_v59, %v88_v50  ;;  %v89_v2 = vshrl.u32 %v609_v51, %v88_v50 }
  0x97   :  { %v100_v4 = vshrl.u32 %v613_v61, %v88_v50  ;;  %v103_v6 = vshrl.u32 %v614_v5, %v88_v50  ;;  %v192_v10 = vsub.s32 32, %v191_v54  ;;  %vm107_vm4 = vcmp.lt.s32.totalorder %v86_v43, 3 }
  0x98   :  { %v92_v7 = vor.u32 %v91_v63, %v90_v52  ;;  %v95_v8 = vor.u32 %v94_v0, %v93_v56  ;;  %v98_v9 = vor.u32 %v97_v1, %v96_v58  ;;  %vm108_vm5 = vcmp.lt.s32.totalorder %v86_v43, 4 }
  0x99   :  { %v101_v11 = vor.u32 %v100_v4, %v99_v60  ;;  %v104_v12 = vor.u32 %v103_v6, %v102_v62  ;;  %v194_v25 = vshll.u32 %v609_v51, %v191_v54  ;;  %v195_v28 = vshrl.u32 %v610_v55, %v192_v10 }
  0x9a   :  { %v109_v13 = vsel %vm105_vm2, %v89_v2, %v92_v7  ;;  %v110_v14 = vsel %vm108_vm5, %v98_v9, 2102212464  ;;  %v113_v15 = vsel %vm105_vm2, %v92_v7, %v95_v8  ;;  %v117_v16 = vsel %vm105_vm2, %v95_v8, %v98_v9 }
  0x9b   :  { %v111_v17 = vsel %vm107_vm4, %v95_v8, %v110_v14  ;;  %v114_v18 = vsel %vm108_vm5, %v101_v11, 920167782  ;;  %v118_v23 = vsel %vm108_vm5, %v104_v12, 1326507024  ;;  %v197_v29 = vshll.u32 %v610_v55, %v191_v54 }
  0x9c   :  { %v115_v26 = vsel %vm107_vm4, %v98_v9, %v114_v18  ;;  %v119_v27 = vsel %vm107_vm4, %v101_v11, %v118_v23  ;;  %v112_v30 = vsel %vm106_vm3, %v109_v13, %v111_v17  ;;  %v198_v33 = vshrl.u32 %v611_v57, %v192_v10 }
  0x9d   :  { %v116_v31 = vsel %vm106_vm3, %v113_v15, %v115_v26  ;;  %v120_v32 = vsel %vm106_vm3, %v117_v16, %v119_v27  ;;  %v196_v38 = vor.u32 %v195_v28, %v194_v25  ;;  %v200_v40 = vshll.u32 %v611_v57, %v191_v54 }
  0x9e   :  { %v702_v34 = vmul.u32.u64.low %v671_v47, %v120_v32  ;;  %v703_v35 = vmul.u32.u64.high %v671_v47, %v120_v32, %v702_v34  ;;  %v706_v36 = vmul.u32.u64.low %v671_v47, %v116_v31  ;;  %v707_v37 = vmul.u32.u64.high %v671_v47, %v116_v31, %v706_v36 }
  0x9f   :  { %v199_v39 = vor.u32 %v198_v33, %v197_v29  ;;  %v201_v42 = vshrl.u32 %v612_v59, %v192_v10  ;;  %v193_v43 = vshrl.u32 %v609_v51, %v192_v10  ;;  %v203_v44 = vshll.u32 %v612_v59, %v191_v54 }
  0xa0   :  { %v204_v45 = vshrl.u32 %v613_v61, %v192_v10  ;;  %v207_v50 = vshrl.u32 %v614_v5, %v192_v10  ;;  %v128_v52 = vmul.u32 %v671_v47, %v112_v30  ;;  %v206_v58 = vshll.u32 %v613_v61, %v191_v54 }
  0xa1   :  { %v202_v56 = vor.u32 %v201_v42, %v200_v40  ;;  %vm209_vm7 = vcmp.lt.s32.totalorder %v678_v53, 1  ;;  %vm130_vm8 = vc.u32 %v703_v35, %v706_v36  ;;  %v131_v60 = vadd.s32 1, %v707_v37 }
  0xa2   :  { %v205_v62 = vor.u32 %v204_v45, %v203_v44  ;;  %vm210_vm9 = vcmp.lt.s32.totalorder %v678_v53, 2  ;;  %v208_v63 = vor.u32 %v207_v50, %v206_v58  ;;  %vm211_vm10 = vcmp.lt.s32.totalorder %v678_v53, 3 }
  0xa3   :  { %vm212_vm11 = vcmp.lt.s32.totalorder %v678_v53, 4  ;;  %v217_v0 = vsel %vm209_vm7, %v196_v38, %v199_v39  ;;  %v132_v47 = vsel %vm130_vm8, %v131_v60, %v707_v37  ;;  %v221_v2 = vsel %vm209_vm7, %v199_v39, %v202_v56 }
  0xa4   :  { %v214_v1 = vsel %vm212_vm11, %v202_v56, 2102212464  ;;  %v218_v54 = vsel %vm212_vm11, %v205_v62, 920167782  ;;  %v133_v4 = vadd.s32 %v132_v47, %v128_v52  ;;  %v213_v6 = vsel %vm209_vm7, %v193_v43, %v196_v38 }
  0xa5   :  { %v219_v7 = vsel %vm211_vm10, %v202_v56, %v218_v54  ;;  %v222_v8 = vsel %vm212_vm11, %v208_v63, 1326507024  ;;  %v215_v9 = vsel %vm211_vm10, %v199_v39, %v214_v1  ;;  %v293_v12 = vsel %vm292_vm6, %v675_v49, 0 }
  0xa6   :  { %v220_v10 = vsel %vm210_vm9, %v217_v0, %v219_v7  ;;  %v223_v11 = vsel %vm211_vm10, %v205_v62, %v222_v8  ;;  %v134_v13 = vadd.s32 536870912, %v133_v4  ;;  %v216_v25 = vsel %vm210_vm9, %v213_v6, %v215_v9 }
  0xa7   :  { %v224_v14 = vsel %vm210_vm9, %v221_v2, %v223_v11  ;;  %v734_v15 = vmul.u32.u64.low %v673_v48, %v220_v10  ;;  %v735_v16 = vmul.u32.u64.high %v673_v48, %v220_v10, %v734_v15  ;;  %v295_v26 = vand.u32 31, %v293_v12 }
  0xa8   :  { %v739_v17 = vmul.u32.u64.low %v673_v48, %v224_v14  ;;  %v740_v18 = vmul.u32.u64.high %v673_v48, %v224_v14, %v739_v17  ;;  %v742_v23 = vshrl.u32 %v134_v13, 30  ;;  %v748_v49 = vadd.f32 %v667_v41, %v669_v46 }
  0xa9   :  { %v235_v28 = vadd.s32 1, %v735_v16  ;;  %v296_v29 = vsub.s32 32, %v295_v26  ;;  %v232_v30 = vmul.u32 %v673_v48, %v216_v25  ;;  %v281_v31 = vand.u32 2147483647, %v655_v21 }
  0xaa   :  { %v136_v27 = vshll.u32 %v742_v23, 30  ;;  %vm234_vm12 = vc.u32 %v740_v18, %v734_v15  ;;  %v388_v46 = vand.u32 2139095040, %v748_v49  ;;  %v294_v39 = vshrl.u32 %v293_v12, 5 }
  0xab   :  { %v236_v53 = vsel %vm234_vm12, %v235_v28, %v735_v16  ;;  %v299_v41 = vshrl.u32 %v610_v55, %v296_v29  ;;  %v288_v37 = vand.u32 8388607, %v281_v31  ;;  %v302_v48 = vshrl.u32 %v611_v57, %v296_v29 }
  0xac   :  { %v237_v32 = vadd.s32 %v236_v53, %v232_v30  ;;  %v757_v33 = vsub.s32 %v133_v4, %v136_v27  ;;  %v305_v38 = vshrl.u32 %v612_v59, %v296_v29  ;;  %v298_v40 = vshll.u32 %v609_v51, %v295_v26 }
  0xad   :  { %v301_v42 = vshll.u32 %v610_v55, %v295_v26  ;;  %v308_v43 = vshrl.u32 %v613_v61, %v296_v29  ;;  %v304_v45 = vshll.u32 %v611_v57, %v295_v26  ;;  %v307_v50 = vshll.u32 %v612_v59, %v295_v26 }
  0xae   :  { %v238_v34 = vadd.s32 536870912, %v237_v32  ;;  %v311_v52 = vshrl.u32 %v614_v5, %v296_v29  ;;  %v139_v56 = vsub.s32 0, %v757_v33  ;;  %v300_v58 = vor.u32 %v299_v41, %v298_v40 }
  0xaf   :  { %v310_v60 = vshll.u32 %v613_v61, %v295_v26  ;;  %v389_v62 = vshrl.u32 %v388_v46, 23  ;;  %v303_v0 = vor.u32 %v302_v48, %v301_v42  ;;  %v306_v47 = vor.u32 %v305_v38, %v304_v45 }
  0xb0   :  { %v768_v44 = vshrl.u32 %v238_v34, 30  ;;  %v309_v1 = vor.u32 %v308_v43, %v307_v50  ;;  %vm316_vm13 = vcmp.lt.s32.totalorder %v294_v39, 4  ;;  %v289_v4 = vor.u32 8388608, %v288_v37 }
  0xb1   :  { %v312_v54 = vor.u32 %v311_v52, %v310_v60  ;;  %v527_v7 = vmin.u32 %v139_v56, %v757_v33  ;;  %vm313_vm14 = vcmp.lt.s32.totalorder %v294_v39, 1  ;;  %vm315_vm15 = vcmp.lt.s32.totalorder %v294_v39, 3 }
  0xb2   :  { %v240_v63 = vshll.u32 %v768_v44, 30  ;;  %v322_v6 = vsel %vm316_vm13, %v309_v1, 920167782  ;;  %v538_v8 = vadd.s32 4294967169, %v389_v62  ;;  %v321_v10 = vsel %vm313_vm14, %v300_v58, %v303_v0 }
  0xb3   :  { %v323_v11 = vsel %vm315_vm15, %v306_v47, %v322_v6  ;;  %v325_v12 = vsel %vm313_vm14, %v303_v0, %v306_v47  ;;  %v326_v13 = vsel %vm316_vm13, %v312_v54, 1326507024  ;;  %vm314_vm0 = vcmp.lt.s32.totalorder %v294_v39, 2 }
  0xb4   :  { %v776_v2 = vsub.s32 %v237_v32, %v240_v63  ;;  %v318_v14 = vsel %vm316_vm13, %v306_v47, 2102212464  ;;  %v327_v16 = vsel %vm315_vm15, %v309_v1, %v326_v13  ;;  %v329_v17 = vshll.u32 %v289_v4, 8 }
  0xb5   :  { %v297_v25 = vshrl.u32 %v609_v51, %v296_v29  ;;  %v324_v26 = vsel %vm314_vm0, %v321_v10, %v323_v11  ;;  %v328_v27 = vsel %vm314_vm0, %v325_v12, %v327_v16  ;;  %v395_v28 = vadd.s32 1, %v538_v8 }
  0xb6   :  { %v243_v9 = vsub.s32 0, %v776_v2  ;;  %v141_v30 = vclz %v527_v7  ;;  %v319_v41 = vsel %vm315_vm15, %v303_v0, %v318_v14  ;;  %v385_v52 = vand.u32 2147483647, %v748_v49 }
  0xb7   :  { %v317_v32 = vsel %vm313_vm14, %v297_v25, %v300_v58  ;;  %v790_v46 = vmul.u32.u64.low %v329_v17, %v328_v27  ;;  %v791_v34 = vmul.u32.u64.high %v329_v17, %v328_v27, %v790_v46  ;;  %vm396_vm1 = vcmp.gt.s32.totalorder %v395_v28, 0 }
  0xb8   :  { %v531_v53 = vmin.u32 %v243_v9, %v776_v2  ;;  %v793_v37 = vmul.u32.u64.low %v329_v17, %v324_v26  ;;  %v794_v48 = vmul.u32.u64.high %v329_v17, %v324_v26, %v793_v37  ;;  %v397_v29 = vsel %vm396_vm1, %v395_v28, 0 }
  0xb9   :  { %v528_v38 = vadd.s32 4294967294, %v141_v30  ;;  %v320_v42 = vsel %vm314_vm0, %v317_v32, %v319_v41  ;;  %v399_v43 = vand.u32 31, %v397_v29  ;;  %v392_v1 = vand.u32 8388607, %v385_v52 }
  0xba   :  { %v245_v40 = vclz %v531_v53  ;;  %vm338_vm2 = vc.u32 %v791_v34, %v793_v37  ;;  %v339_v45 = vadd.s32 1, %v794_v48  ;;  %v336_v50 = vmul.u32 %v329_v17, %v320_v42 }
  0xbb   :  { %v400_v56 = vsub.s32 32, %v399_v43  ;;  %vm529_vm3 = vcmp.lt.s32.totalorder %v528_v38, 0  ;;  %v402_v54 = vshll.u32 %v609_v51, %v399_v43  ;;  %v405_v4 = vshll.u32 %v610_v55, %v399_v43 }
  0xbc   :  { %v532_v58 = vadd.s32 4294967294, %v245_v40  ;;  %v340_v60 = vsel %vm338_vm2, %v339_v45, %v794_v48  ;;  %v805_v0 = vsel %vm529_vm3, 0, %v528_v38  ;;  %v398_v8 = vshrl.u32 %v397_v29, 5 }
  0xbd   :  { %v341_v62 = vadd.s32 %v340_v60, %v336_v50  ;;  %v403_v63 = vshrl.u32 %v610_v55, %v400_v56  ;;  %v406_v39 = vshrl.u32 %v611_v57, %v400_v56  ;;  %v409_v6 = vshrl.u32 %v612_v59, %v400_v56 }
  0xbe   :  { %vm533_vm4 = vcmp.lt.s32.totalorder %v532_v58, 0  ;;  %v411_v9 = vshll.u32 %v612_v59, %v399_v43  ;;  %v412_v10 = vshrl.u32 %v613_v61, %v400_v56  ;;  %v408_v13 = vshll.u32 %v611_v57, %v399_v43 }
  0xbf   :  { %v342_v47 = vadd.s32 536870912, %v341_v62  ;;  %v404_v11 = vor.u32 %v403_v63, %v402_v54  ;;  %v407_v12 = vor.u32 %v406_v39, %v405_v4  ;;  %v415_v14 = vshrl.u32 %v614_v5, %v400_v56 }
  0xc0   :  { %v149_v16 = vsub.s32 4294967266, %v805_v0  ;;  %v413_v55 = vor.u32 %v412_v10, %v411_v9  ;;  %v393_v25 = vor.u32 8388608, %v392_v1  ;;  %v410_v26 = vor.u32 %v409_v6, %v408_v13 }
  0xc1   :  { %v812_v7 = vshrl.u32 %v342_v47, 30  ;;  %v414_v27 = vshll.u32 %v613_v61, %v399_v43  ;;  %v248_v28 = vsel %vm533_vm4, 0, %v532_v58  ;;  %vm417_vm5 = vcmp.lt.s32.totalorder %v398_v8, 1 }
  0xc2   :  { %vm420_vm6 = vcmp.lt.s32.totalorder %v398_v8, 4  ;;  %v425_v57 = vsel %vm417_vm5, %v404_v11, %v407_v12  ;;  %v150_v53 = vadd.s32 127, %v149_v16  ;;  %vm419_vm7 = vcmp.lt.s32.totalorder %v398_v8, 3 }
  0xc3   :  { %v344_v17 = vshll.u32 %v812_v7, 30  ;;  %v416_v30 = vor.u32 %v415_v14, %v414_v27  ;;  %v426_v32 = vsel %vm420_vm6, %v413_v55, 920167782  ;;  %v253_v41 = vsub.s32 4294967266, %v248_v28 }
  0xc4   :  { %vm418_vm8 = vcmp.lt.s32.totalorder %v398_v8, 2  ;;  %v427_v46 = vsel %vm419_vm7, %v410_v26, %v426_v32  ;;  %v433_v48 = vshll.u32 %v393_v25, 8  ;;  %v401_v29 = vshrl.u32 %v609_v51, %v400_v56 }
  0xc5   :  { %v822_v59 = vsub.s32 %v341_v62, %v344_v17  ;;  %v422_v38 = vsel %vm420_vm6, %v410_v26, 2102212464  ;;  %v428_v40 = vsel %vm418_vm8, %v425_v57, %v427_v46  ;;  %v429_v42 = vsel %vm417_vm5, %v407_v12, %v410_v26 }
  0xc6   :  { %v430_v43 = vsel %vm420_vm6, %v416_v30, 1326507024  ;;  %v831_v45 = vmul.u32.u64.low %v433_v48, %v428_v40  ;;  %v832_v50 = vmul.u32.u64.high %v433_v48, %v428_v40, %v831_v45  ;;  %v145_v58 = vsub.s32 32, %v805_v0 }
  0xc7   :  { %v347_v5 = vsub.s32 0, %v822_v59  ;;  %v254_v62 = vadd.s32 127, %v253_v41  ;;  %v421_v63 = vsel %vm417_vm5, %v401_v29, %v404_v11  ;;  %v423_v39 = vsel %vm419_vm7, %v407_v12, %v422_v38 }
  0xc8   :  { %v431_v51 = vsel %vm419_vm7, %v413_v55, %v430_v43  ;;  %v129_v56 = vadd.s32 %v706_v36, %v703_v35  ;;  %v151_v47 = vshll.u32 %v150_v53, 23  ;;  %v249_v4 = vsub.s32 32, %v248_v28 }
  0xc9   :  { %v535_v61 = vmin.u32 %v347_v5, %v822_v59  ;;  %v432_v54 = vsel %vm418_vm8, %v429_v42, %v431_v51  ;;  %v424_v13 = vsel %vm418_vm8, %v421_v63, %v423_v39  ;;  %v443_v11 = vadd.s32 1, %v832_v50 }
  0xca   :  { %v842_v6 = vmul.u32.u64.low %v433_v48, %v432_v54  ;;  %v843_v9 = vmul.u32.u64.high %v433_v48, %v432_v54, %v842_v6  ;;  %v147_v10 = vshrl.u32 %v129_v56, %v145_v58  ;;  %v233_v12 = vadd.s32 %v734_v15, %v740_v18 }
  0xcb   :  { %v349_v60 = vclz %v535_v61  ;;  %v255_v14 = vshll.u32 %v254_v62, 23  ;;  %v146_v35 = vshll.u32 %v757_v33, %v805_v0  ;;  %v152_v36 = vor.u32 4788187, %v151_v47 }
  0xcc   :  { %v251_v55 = vshrl.u32 %v233_v12, %v249_v4  ;;  %v440_v26 = vmul.u32 %v433_v48, %v424_v13  ;;  %vm442_vm10 = vc.u32 %v843_v9, %v831_v45  ;;  %v250_v57 = vshll.u32 %v776_v2, %v248_v28 }
  0xcd   :  { %v536_v1 = vadd.s32 4294967294, %v349_v60  ;;  %v148_v8 = vor.u32 %v147_v10, %v146_v35  ;;  %v444_v30 = vsel %vm442_vm10, %v443_v11, %v832_v50  ;;  %v256_v15 = vor.u32 4788187, %v255_v14 }
  0xce   :  { %v337_v18 = vadd.s32 %v793_v37, %v791_v34  ;;  %v445_v53 = vadd.s32 %v444_v30, %v440_v26  ;;  %v153_v33 = vand.u32 2147483647, %v152_v36  ;;  %v252_v5 = vor.u32 %v251_v55, %v250_v57 }
  0xcf   :  { %vm537_vm9 = vcmp.lt.s32.totalorder %v536_v1, 0  ;;  %v155_v46 = vcvt.s32.f32 %v148_v8  ;;  %v257_v48 = vand.u32 2147483647, %v256_v15  ;;  %vm75_vm11 = vcmp.lt.s32.totalorder %v651_v19, 0 }
  0xd0   :  { %v352_v16 = vsel %vm537_vm9, 0, %v536_v1  ;;  %v446_v41 = vadd.s32 536870912, %v445_v53  ;;  %v259_v42 = vcvt.s32.f32 %v252_v5  ;;  %vm866_vm12 = vcmp.le.f32.partialorder %v73_v22, 0.7853982 }
  0xd1   :  { %v357_v17 = vsub.s32 4294967266, %v352_v16  ;;  %v353_v25 = vsub.s32 32, %v352_v16  ;;  %v354_v61 = vshll.u32 %v822_v59, %v352_v16  ;;  %v156_v40 = vmul.f32 %v155_v46, %v153_v33 }
  0xd2   :  { %v858_v38 = vshrl.u32 %v446_v41, 30  ;;  %v260_v43 = vmul.f32 %v259_v42, %v257_v48  ;;  %vm179_vm13 = vcmp.lt.s32.totalorder %v653_v20, 0  ;;  %v159_v6 = vsub.s32 4, %v742_v23 }
  0xd3   :  { %v358_v27 = vadd.s32 127, %v357_v17  ;;  %v355_v32 = vshrl.u32 %v337_v18, %v353_v25  ;;  %v157_v50 = vxor.u32 2147483648, %v156_v40  ;;  %vm879_vm14 = vcmp.le.f32.partialorder %v177_v24, 0.7853982 }
  0xd4   :  { %v448_v28 = vshll.u32 %v858_v38, 30  ;;  %v261_v62 = vxor.u32 2147483648, %v260_v43  ;;  %vm283_vm15 = vcmp.lt.s32.totalorder %v655_v21, 0  ;;  %v263_v10 = vsub.s32 4, %v768_v44 }
  0xd5   :  { %v359_v0 = vshll.u32 %v358_v27, 23  ;;  %v356_v2 = vor.u32 %v355_v32, %v354_v61  ;;  %v158_v59 = vsel %vm75_vm11, %v157_v50, %v156_v40  ;;  %v441_v24 = vadd.s32 %v831_v45, %v843_v9 }
  0xd6   :  { %v449_v37 = vsub.s32 %v445_v53, %v448_v28  ;;  %v161_v47 = vsel %vm866_vm12, %v651_v19, %v158_v59  ;;  %v262_v1 = vsel %vm179_vm13, %v261_v62, %v260_v43  ;;  %vm894_vm1 = vcmp.le.f32.partialorder %v281_v31, 0.7853982 }
  0xd7   :  { %v360_v29 = vor.u32 4788187, %v359_v0  ;;  %v363_v58 = vcvt.s32.f32 %v356_v2  ;;  %568 = vcosq.f32 %v161_v47  ;;  %v265_v13 = vsel %vm879_vm14, %v653_v20, %v262_v1 }
  0xd8   :  { %v451_v60 = vsub.s32 0, %v449_v37  ;;  %570 = vsinq.f32 %v161_v47  ;;  %v160_v25 = vsel %vm75_vm11, %v159_v6, %v742_v23  ;;  %v264_v31 = vsel %vm179_vm13, %v263_v10, %v768_v44 }
  0xd9   :  { %v361_v34 = vand.u32 2147483647, %v360_v29  ;;  %572 = vcosq.f32 %v265_v13  ;;  %v367_v9 = vsub.s32 4, %v812_v7  ;;  %v162_v27 = vsel %vm866_vm12, 0, %v160_v25 }
  0xda   :  { %v539_v39 = vmin.u32 %v451_v60, %v449_v37  ;;  %574 = vsinq.f32 %v265_v13  ;;  %v266_v23 = vsel %vm879_vm14, 0, %v264_v31  ;;  %v166_v53 = vadd.s32 3, %v162_v27 }
  0xdb   :  { %v364_v63 = vmul.f32 %v363_v58, %v361_v34  ;;  %v368_v57 = vsel %vm283_vm15, %v367_v9, %v812_v7  ;;  %v270_v33 = vadd.s32 3, %v266_v23  ;;  %v471_v5 = vsub.s32 4, %v858_v38 }
  0xdc   :  { %v453_v51 = vclz %v539_v39  ;;  %v370_v41 = vsel %vm894_vm1, 0, %v368_v57  ;;  %v167_v29 = vand.u32 3, %v166_v53  ;;  %vm920_vm2 = vcmp.le.f32.partialorder %v385_v52, 0.7853982 }
  0xdd   :  { %v365_v54 = vxor.u32 2147483648, %v364_v63  ;;  %vm387_vm3 = vcmp.lt.s32.totalorder %v748_v49, 0  ;;  %v271_v40 = vand.u32 3, %v270_v33  ;;  %v374_v42 = vadd.s32 3, %v370_v41 }
  0xde   :  { %v540_v4 = vadd.s32 4294967294, %v453_v51  ;;  %v472_v28 = vsel %vm387_vm3, %v471_v5, %v858_v38  ;;  %vm169_vm4 = vcmp.eq.s32.totalorder %v167_v29, 0  ;;  %vm172_vm5 = vcmp.eq.s32.totalorder %v167_v29, 2 }
  0xdf   :  { %v366_v12 = vsel %vm283_vm15, %v365_v54, %v364_v63  ;;  %v474_v62 = vsel %vm920_vm2, 0, %v472_v28  ;;  %vm273_vm6 = vcmp.eq.s32.totalorder %v271_v40, 0  ;;  %vm276_vm7 = vcmp.eq.s32.totalorder %v271_v40, 2 }
  0xe0   :  { %vm541_vm0 = vcmp.lt.s32.totalorder %v540_v4, 0  ;;  %v369_v45 = vsel %vm894_vm1, %v655_v21, %v366_v12  ;;  %v375_v59 = vand.u32 3, %v374_v42  ;;  %v478_v1 = vadd.s32 3, %v474_v62 }
  0xe1   :  { %v456_v11 = vsel %vm541_vm0, 0, %v540_v4  ;;  %576 = vcosq.f32 %v369_v45  ;;  %v569_v44 = vpop.eup %568  ;;  %v615_v54 = vmov 1983009808   ;;  %vm168_vm8 = vcmp.lt.s32.totalorder %v167_v29, 2 }
  0xe2   :  { %v457_v14 = vsub.s32 32, %v456_v11  ;;  %v461_v16 = vsub.s32 4294967266, %v456_v11  ;;  %v458_v36 = vshll.u32 %v449_v37, %v456_v11  ;;  %578 = vsinq.f32 %v369_v45  ;;  %v571_v32 = vpop.eup %570 }
  0xe3   :  { %v573_v46 = vpop.eup %572  ;;  %v170_v43 = vxor.u32 2147483648, %v571_v32  ;;  %v173_v34 = vxor.u32 2147483648, %v569_v44  ;;  %v496_v4 = vunpack.c.l.s4 %v615_v54  ;;  %vm272_vm9 = vcmp.lt.s32.totalorder %v271_v40, 2 }
  0xe4   :  { %v459_v17 = vshrl.u32 %v441_v24, %v457_v14  ;;  %v462_v55 = vadd.s32 127, %v461_v16  ;;  %v575_v61 = vpop.eup %574  ;;  %v277_v37 = vxor.u32 2147483648, %v573_v46  ;;  %vm377_vm10 = vcmp.eq.s32.totalorder %v375_v59, 0 }
  0xe5   :  { %v274_v60 = vxor.u32 2147483648, %v575_v61  ;;  %v171_v38 = vsel %vm169_vm4, %v569_v44, %v170_v43  ;;  %v174_v63 = vsel %vm172_vm5, %v173_v34, %v571_v32  ;;  %vm380_vm11 = vcmp.eq.s32.totalorder %v375_v59, 2 }
  0xe6   :  { %v460_v26 = vor.u32 %v459_v17, %v458_v36  ;;  %v463_v8 = vshll.u32 %v462_v55, 23  ;;  %v278_v39 = vsel %vm276_vm7, %v277_v37, %v575_v61  ;;  %v175_v6 = vsel %vm168_vm8, %v171_v38, %v174_v63 }
  0xe7   :  { %v275_v51 = vsel %vm273_vm6, %v573_v46, %v274_v60  ;;  %v479_v11 = vand.u32 3, %v478_v1  ;;  %vm165_vm12 = vweird.f32 %v651_v19  ;;  %vm269_vm13 = vweird.f32 %v653_v20 }
  0xe8   :  { %v464_v30 = vor.u32 4788187, %v463_v8  ;;  %v467_v18 = vcvt.s32.f32 %v460_v26  ;;  %v279_v22 = vsel %vm272_vm9, %v275_v51, %v278_v39  ;;  %v497_v12 = vunpack.c.0.s8 %v496_v4 }
  0xe9   :  { %v176_v14 = vsel %vm165_vm12, nan, %v175_v6  ;;  %v280_v16 = vsel %vm269_vm13, nan, %v279_v22  ;;  %vm376_vm14 = vcmp.lt.s32.totalorder %v375_v59, 2  ;;  %vm373_vm15 = vweird.f32 %v655_v21 }
  0xea   :  { %v465_v15 = vand.u32 2147483647, %v464_v30  ;;  %vm484_vm0 = vcmp.eq.s32.totalorder %v479_v11, 2  ;;  %vm481_vm1 = vcmp.eq.s32.totalorder %v479_v11, 0  ;;  %v493_v45 = vcombine.low %v176_v14, %v280_v16 }
  0xeb   :  { %v577_v58 = vpop.eup %576  ;;  %v500_v31 = vsub.s32 %v497_v12, %v640_v3 }
  0xec   :  { %v468_v0 = vmul.f32 %v467_v18, %v465_v15  ;;  %v579_v52 = vpop.eup %578  ;;  %v381_v47 = vxor.u32 2147483648, %v577_v58 }
  0xed   :  { %v378_v56 = vxor.u32 2147483648, %v579_v52  ;;  %v501_v27 = vrot.slane %v493_v45, %v500_v31 }
  0xee   :  { %v469_v48 = vxor.u32 2147483648, %v468_v0  ;;  %v382_v13 = vsel %vm380_vm11, %v381_v47, %v579_v52 }
  0xef   :  { %v379_v10 = vsel %vm377_vm10, %v577_v58, %v378_v56 }
  0xf0   :  { %v470_v2 = vsel %vm387_vm3, %v469_v48, %v468_v0  ;;  %v383_v36 = vsel %vm376_vm14, %v379_v10, %v382_v13  ;;  %vm477_vm3 = vweird.f32 %v748_v49 }
  0xf1   :  { %v473_v50 = vsel %vm920_vm2, %v748_v49, %v470_v2  ;;  %v384_v19 = vsel %vm373_vm15, nan, %v383_v36  ;;  %vm480_vm2 = vcmp.lt.s32.totalorder %v479_v11, 2 }
  0xf2   :  { %580 = vcosq.f32 %v473_v50 }
  0xf3   :  { %582 = vsinq.f32 %v473_v50 }
  0xfc   :  { %v581_v24 = vpop.eup %580 }
  0xfd   :  { %v583_v35 = vpop.eup %582  ;;  %v485_v17 = vxor.u32 2147483648, %v581_v24 }
  0xfe   :  { %v482_v55 = vxor.u32 2147483648, %v583_v35 }
  0xff   :  { %v486_v25 = vsel %vm484_vm0, %v485_v17, %v583_v35 }
 0x100   :  { %v483_v20 = vsel %vm481_vm1, %v581_v24, %v482_v55 }
 0x101   :  { %v487_v9 = vsel %vm480_vm2, %v483_v20, %v486_v25 }
 0x102   :  { %v488_v26 = vsel %vm477_vm3, nan, %v487_v9 }
 0x103   :  { %v494_v8 = vcombine.low %v384_v19, %v488_v26 }
 0x105   :  { %v508_v30 = vrot.slane %v494_v8, %v500_v31 }
 0x107   :  { %v509_v21 = vcombine.low %v501_v27, %v508_v30 }
 0x109   :  { %511 = vst [vmem:[#allocation2] sm:$0xff] %v509_v21 }
 0x10a   :  { %595 = shalt.err (!%p592_p4)
}
 0x10b   :  { %s596_s20 = scalar_lea.hbm %s951_s3, 128 }
 0x10c   :  { %p597_p5 = scmp.ne.s32.totalorder %s951_s3, %s596_s20  ;;  %p600_p6 = scmp.lt.u32.totalorder %s596_s20, %s951_s3 }
 0x10e   :  { %p602_p7 = pnand %p600_p6, %p597_p5 }
 0x110   :  { %605 = shalt.err (!%p602_p7)
}
 0x111   :  { %521 = dma.vmem_to_hbm [thread:$0]  %s519_s1, 128, %s951_s3, [#allocation3]  }
 0x112   :  { %606 = dma.done.wait [#allocation3], 128  }
 0x113   :  { %607 = vsyncadd [#allocation3], 4294967168 }
 0x114   :  { %525 = vsyncpa [#allocation3], 1 }

</bundles_post_ra>
